<compile_context>
chip_gen: v7x
topology: tpu7x:2x2x1
jax: 0.10.0
libtpu: 0.0.40
codegen_flags: <defaults>
</compile_context>

<pallas_src>
import jax
import jax.numpy as jnp
from jax.experimental import pallas as pl
from jax.experimental.pallas import tpu as pltpu


def _conv_bn_relu_kernel(x_ref, w_ref, s_ref, b_ref, o_ref):
    # x_ref: (TILE_N, C1, TILE_P)       f32  pixel slab(s), NCHW with spatial flattened
    # w_ref: (TILE_C2, C1)              bf16 unscaled 1x1 conv weight
    # s_ref: (TILE_C2, 1)               f32  folded BN scale (gamma / sqrt(var+eps))
    # b_ref: (TILE_C2, 1)               f32  folded BN bias
    # o_ref: (TILE_N, TILE_C2, TILE_P)  bf16 output (lane-dense last dim)
    w = w_ref[...]
    scale = s_ref[...]
    bias = b_ref[...]
    for i in range(x_ref.shape[0]):               # static unroll over images in block
        x = x_ref[i].astype(jnp.bfloat16)         # in-kernel f32 -> bf16 cast (VPU)
        y = jnp.dot(w, x, preferred_element_type=jnp.float32)   # MXU, f32 accumulate
        y = y * scale + bias                      # per-channel BN epilogue in f32
        o_ref[i] = jnp.maximum(y, 0.0).astype(o_ref.dtype)      # ReLU + bf16 pack


def _vmem_budget_bytes():
    # v5e/v6e: 128 MiB physical VMEM; v7x: 64 MiB per TensorCore.  Leave headroom
    # for compiler scratch and pipelining bookkeeping.
    try:
        cap = int(pltpu.get_tpu_info().vmem_capacity_bytes)
    except Exception:
        cap = 64 * 1024 * 1024  # conservative fallback (v7x-sized)
    tile_budget = min(int(cap * 0.55), 72 * 1024 * 1024)
    vmem_limit = min(int(cap * 0.75), 96 * 1024 * 1024)
    return tile_budget, vmem_limit


def _pick_tile_c2(c2):
    # MXU-aligned output-channel tile when channels are large; full c2 otherwise.
    for cand in (256, 128):
        if c2 > cand and c2 % cand == 0:
            return cand
    return c2


def _choose_tiles(n, c1, tc2, c2_blocks, p, tile_budget_bytes):
    # Pixel tile: multiple of 128 that divides P (or full P).  Batch tile: divisor of N.
    p_cands = [c for c in (4096, 2048, 1024, 512, 256, 128) if p % c == 0] or [p]
    n_cands = [d for d in range(n, 0, -1) if n % d == 0]
    w_bytes = tc2 * c1 * 2 + 2 * tc2 * 4  # bf16 weight + f32 scale + f32 bias

    def footprint(tn, tp):
        x_b = tn * c1 * tp * 4      # f32 activation slab
        o_b = tn * tc2 * tp * 2     # bf16 output slab
        acc_b = tn * tc2 * tp * 4   # f32 matmul intermediate
        return 2 * (x_b + o_b + w_bytes) + acc_b   # 2x for double-buffering

    # Prefer (a) >= 2 grid steps (megacore load balance on v7x + pipelining),
    # (b) the largest per-step slab that fits the VMEM budget.
    for want_multi_step in (True, False):
        for tp in p_cands:
            for tn in n_cands:
                if footprint(tn, tp) > tile_budget_bytes:
                    continue
                if want_multi_step and (n // tn) * c2_blocks * (p // tp) < 2:
                    continue
                return tn, tp
    return 1, p_cands[-1]


def conv_module_forward(x_nchw, weight_oihw, gamma, beta, running_mean,
                        running_var, eps=1e-3, out_dtype=jnp.bfloat16):
    """Forward of ConvModule(c1, c2, k=1, s=1, p=0, g=1, act=True) in eval mode."""
    n, c1, h, w = x_nchw.shape
    c2 = weight_oihw.shape[0]
    assert weight_oihw.shape == (c2, c1, 1, 1)
    p = h * w

    tile_budget, vmem_limit = _vmem_budget_bytes()
    tc2 = _pick_tile_c2(c2)
    c2_blocks = c2 // tc2
    tn, tp = _choose_tiles(n, c1, tc2, c2_blocks, p, tile_budget)

    # Fold inference BatchNorm into per-channel (scale, bias); applied to the f32
    # accumulator inside the kernel (weight stays unscaled in bf16).
    inv_std = jax.lax.rsqrt(running_var.astype(jnp.float32) + eps)
    bn_scale = (gamma.astype(jnp.float32) * inv_std).reshape(c2, 1)
    bn_bias = (beta.astype(jnp.float32)
               - running_mean.astype(jnp.float32) * bn_scale[:, 0]).reshape(c2, 1)

    w_bf16 = weight_oihw.reshape(c2, c1).astype(jnp.bfloat16)   # (C2, C1)

    # Keep NCHW; flatten spatial only (pure reshape, no dtype cast, no transpose).
    x_flat = x_nchw.reshape(n, c1, p)

    flops = 2 * n * p * c1 * c2
    bytes_accessed = (n * c1 * p * x_flat.dtype.itemsize     # x (f32, read once)
                      + c2 * c1 * 2 + 2 * c2 * 4             # weight + scale + bias
                      + n * c2 * p * jnp.dtype(out_dtype).itemsize)  # bf16 output

    grid = (n // tn, c2_blocks, p // tp)

    out_flat = pl.pallas_call(
        _conv_bn_relu_kernel,
        out_shape=jax.ShapeDtypeStruct((n, c2, p), out_dtype),
        grid_spec=pl.GridSpec(
            grid=grid,
            in_specs=[
                pl.BlockSpec((tn, c1, tp), lambda i, j, k: (i, 0, k)),
                pl.BlockSpec((tc2, c1), lambda i, j, k: (j, 0)),
                pl.BlockSpec((tc2, 1), lambda i, j, k: (j, 0)),
                pl.BlockSpec((tc2, 1), lambda i, j, k: (j, 0)),
            ],
            out_specs=pl.BlockSpec((tn, tc2, tp), lambda i, j, k: (i, j, k)),
        ),
        compiler_params=pltpu.CompilerParams(
            dimension_semantics=("parallel", "parallel", "parallel"),
            vmem_limit_bytes=vmem_limit),
        cost_estimate=pl.CostEstimate(flops=flops, transcendentals=0,
                                      bytes_accessed=bytes_accessed),
    )(x_flat, w_bf16, bn_scale, bn_bias)

    # (N, C2, P) -> (N, C2, H, W): pure reshape, no data movement.
    return out_flat.reshape(n, c2, h, w)


if __name__ == "__main__":
    key = jax.random.PRNGKey(0)
    k_x, k_w, k_g, k_b, k_m, k_v = jax.random.split(key, 6)

    # Small shapes consistent with the module: c1=4 -> c2=8, 1x1 conv.
    N, C1, H, W = 2, 4, 16, 16
    C2 = 8

    x = jax.random.normal(k_x, (N, C1, H, W), dtype=jnp.float32)
    weight = jax.random.normal(k_w, (C2, C1, 1, 1), dtype=jnp.float32) * 0.1
    gamma = jax.random.normal(k_g, (C2,), dtype=jnp.float32) * 0.1 + 1.0
    beta = jax.random.normal(k_b, (C2,), dtype=jnp.float32) * 0.1
    running_mean = jax.random.normal(k_m, (C2,), dtype=jnp.float32) * 0.1
    running_var = jax.random.uniform(k_v, (C2,), dtype=jnp.float32,
                                     minval=0.5, maxval=1.5)

    out = conv_module_forward(x, weight, gamma, beta, running_mean, running_var)
    out = jax.block_until_ready(out)

    # Silent correctness check against a plain-JAX f32 reference of the module
    # (conv -> BN(eval, eps=1e-3) -> ReLU).  Tolerance covers bf16 MXU inputs and
    # the bf16 output pack.
    ref = jax.lax.conv_general_dilated(
        x, weight, window_strides=(1, 1), padding="VALID",
        dimension_numbers=("NCHW", "OIHW", "NCHW"))
    inv_std = 1.0 / jnp.sqrt(running_var + 1e-3)
    ref = (ref - running_mean[None, :, None, None]) * (gamma * inv_std)[None, :, None, None] \
          + beta[None, :, None, None]
    ref = jnp.maximum(ref, 0.0)
    assert out.shape == (N, C2, H, W) and out.dtype == jnp.bfloat16
    assert jnp.max(jnp.abs(out.astype(jnp.float32) - ref)) < 5e-2

    print("KERNEL_OK")
</pallas_src>

<mosaic_0001>
module attributes {stable_mosaic.version = 11 : i64} {
  func.func @_conv_bn_relu_kernel(%arg0: i32, %arg1: i32, %arg2: i32, %arg3: memref<1x4x256xf32, #tpu.memory_space<vmem>>, %arg4: memref<8x4xbf16, #tpu.memory_space<vmem>>, %arg5: memref<8x1xf32, #tpu.memory_space<vmem>>, %arg6: memref<8x1xf32, #tpu.memory_space<vmem>>, %arg7: memref<1x8x256xbf16, #tpu.memory_space<vmem>>) attributes {dimension_semantics = [#tpu.dimension_semantics<parallel>, #tpu.dimension_semantics<parallel>, #tpu.dimension_semantics<parallel>], iteration_bounds = array<i64: 2, 1, 1>, scalar_prefetch = 0 : i64, scratch_operands = 0 : i64, tpu.core_type = #tpu.core_type<tc>, window_params = [{transform_indices = @transform_0, window_bounds = array<i64: 1, 4, 256>}, {transform_indices = @transform_1, window_bounds = array<i64: 8, 4>}, {transform_indices = @transform_2, window_bounds = array<i64: 8, 1>}, {transform_indices = @transform_3, window_bounds = array<i64: 8, 1>}, {transform_indices = @transform_4, window_bounds = array<i64: 1, 8, 256>}]} {
    %c0 = arith.constant 0 : index
    %c0_0 = arith.constant 0 : index
    %0 = vector.load %arg4[%c0, %c0_0] : memref<8x4xbf16, #tpu.memory_space<vmem>>, vector<8x4xbf16>
    %c0_1 = arith.constant 0 : index
    %c0_2 = arith.constant 0 : index
    %1 = vector.load %arg5[%c0_1, %c0_2] : memref<8x1xf32, #tpu.memory_space<vmem>>, vector<8x1xf32>
    %c0_3 = arith.constant 0 : index
    %c0_4 = arith.constant 0 : index
    %2 = vector.load %arg6[%c0_3, %c0_4] : memref<8x1xf32, #tpu.memory_space<vmem>>, vector<8x1xf32>
    %c0_5 = arith.constant 0 : index
    %c0_6 = arith.constant 0 : index
    %c0_7 = arith.constant 0 : index
    %3 = vector.load %arg3[%c0_5, %c0_6, %c0_7] : memref<1x4x256xf32, #tpu.memory_space<vmem>>, vector<1x4x256xf32>
    %4 = vector.shape_cast %3 : vector<1x4x256xf32> to vector<4x256xf32>
    %5 = arith.truncf %4 : vector<4x256xf32> to vector<4x256xbf16>
    %cst = arith.constant dense<0.000000e+00> : vector<8x256xf32>
    %6 = tpu.matmul %0, %5, %cst {dimension_numbers = #tpu.dot_dimension_numbers<[1], [0], [0], [1], [0, 0, 1, 1], [], []>} : vector<8x4xbf16>, vector<4x256xbf16>, vector<8x256xf32> -> vector<8x256xf32>
    %7 = vector.broadcast %1 : vector<8x1xf32> to vector<8x256xf32>
    %8 = arith.mulf %6, %7 : vector<8x256xf32>
    %9 = vector.broadcast %2 : vector<8x1xf32> to vector<8x256xf32>
    %10 = arith.addf %8, %9 : vector<8x256xf32>
    %cst_8 = arith.constant 0.000000e+00 : f32
    %11 = vector.broadcast %cst_8 : f32 to vector<8x256xf32>
    %12 = arith.maximumf %10, %11 : vector<8x256xf32>
    %13 = arith.truncf %12 : vector<8x256xf32> to vector<8x256xbf16>
    %c0_9 = arith.constant 0 : index
    %c0_10 = arith.constant 0 : index
    %c0_11 = arith.constant 0 : index
    %14 = vector.load %arg7[%c0_9, %c0_10, %c0_11] : memref<1x8x256xbf16, #tpu.memory_space<vmem>>, vector<1x8x256xbf16>
    %15 = vector.shape_cast %14 : vector<1x8x256xbf16> to vector<8x256xbf16>
    %16 = vector.shape_cast %13 : vector<8x256xbf16> to vector<1x8x256xbf16>
    tpu.vector_store %arg7[%c0_9, %c0_10, %c0_11], %16 {strides = array<i32>} : memref<1x8x256xbf16, #tpu.memory_space<vmem>>, vector<1x8x256xbf16>,
    return
  }
  func.func @transform_0(%arg0: i32, %arg1: i32, %arg2: i32) -> (i32, i32, i32) {
    %c0_i32 = arith.constant 0 : i32
    %c0_i32_0 = arith.constant 0 : i32
    return %arg0, %c0_i32, %arg2 : i32, i32, i32
  }
  func.func @transform_1(%arg0: i32, %arg1: i32, %arg2: i32) -> (i32, i32) {
    %c0_i32 = arith.constant 0 : i32
    %c0_i32_0 = arith.constant 0 : i32
    return %arg1, %c0_i32 : i32, i32
  }
  func.func @transform_2(%arg0: i32, %arg1: i32, %arg2: i32) -> (i32, i32) {
    %c0_i32 = arith.constant 0 : i32
    %c0_i32_0 = arith.constant 0 : i32
    return %arg1, %c0_i32 : i32, i32
  }
  func.func @transform_3(%arg0: i32, %arg1: i32, %arg2: i32) -> (i32, i32) {
    %c0_i32 = arith.constant 0 : i32
    %c0_i32_0 = arith.constant 0 : i32
    return %arg1, %c0_i32 : i32, i32
  }
  func.func @transform_4(%arg0: i32, %arg1: i32, %arg2: i32) -> (i32, i32, i32) {
    %c0_i32 = arith.constant 0 : i32
    return %arg0, %arg1, %arg2 : i32, i32, i32
  }
}

</mosaic_0001>

<bundles_post_ra>
// kernel: tpu_custom_call.1
= control target key start
LH: loop header
LB: loop body
LE: loop exit
PB: predicated region body
PF: predicated region fallthrough
CT: control target
= control target key end

     0   :  { %9 = vsyncpa [#allocation3], 0  ;;  %s827_s0 = inlined_call_operand.vmem [shape: f32[2,4,256], index: 0, kind: input, shape index: {}]   ;;  %s828_s1 = inlined_call_operand.vmem [shape: bf16[8,4], index: 1, kind: input, shape index: {}]   ;;  %s829_s2 = inlined_call_operand.vmem [shape: f32[8,1], index: 2, kind: input, shape index: {}]   ;;  %s830_s3 = inlined_call_operand.vmem [shape: f32[8,1], index: 3, kind: input, shape index: {}]   ;;  %s831_s4 = inlined_call_operand.hbm [shape: bf16[2,8,256], index: 4, kind: output, shape index: {}]  }
   0x1   :  { %11 = vsyncpa [#allocation3 + $0x1], 0  ;;  %s706_s15 = smov 0   ;;  %s708_s16 = smov 0  }
   0x2   :  { %s710_s17 = smov 0   ;;  %s712_s18 = smov 0  }
   0x3   :  { %s714_s19 = smov 0   ;;  %s716_s20 = smov 0  }
   0x4 LB: > { %s519_s21 = sadd.s32 4294967295, %s677_s20   ;;  %s520_s22 = sadd.s32 4294967294, %s677_s20   ;;  %s677_s20 = sphi %s716_s20, %s17_s20   ;;  %s673_s19 = sphi %s714_s19, %s838_s19   ;;  %s669_s18 = sphi %s712_s18, %s837_s18   ;;  %s665_s17 = sphi %s710_s17, %s836_s17   ;;  %s661_s16 = sphi %s708_s16, %s835_s16   ;;  %s657_s15 = sphi %s706_s15, %s834_s15  }
   0x5   : > { %s36_s23 = sadd.s32 1, %s673_s19  ;;  %s153_s24 = sadd.s32 1, %s665_s17 }
   0x6   : > { %p38_p0 = scmp.ge.s32.totalorder %s36_s23, 2  ;;  %p163_p1 = scmp.ne.s32.totalorder %s665_s17, %s661_s16 }
   0x7   : > { %p164_p2 = scmp.eq.s32.totalorder %s519_s21, 1  ;;  %p169_p3 = scmp.ne.s32.totalorder %s661_s16, %s657_s15 }
   0x8   : > { %s840_s23 = smov (%p38_p0, %s36_s23), 0  ;;  %p170_p5 = scmp.eq.s32.totalorder %s520_s22, 1 }
   0x9   : > { %p746_p4 = por %p164_p2, %p163_p1  ;;  %s146_s26 = ssub.s32 %s673_s19, %s840_s23 }
   0xa   : > { %p526_p6 = scmp.ge.s32.totalorder %s677_s20, 1  ;;  %p151_p7 = scmp.eq.s32.totalorder %s146_s26, 0 }
   0xb   : > { %p753_p8 = por %p170_p5, %p169_p3  ;;  %p222_p9 = scmp.lt.s32.totalorder %s677_s20, 3 }
   0xc   : > { %s759_s28 = scalar_select %p151_p7, %s665_s17, %s153_s24  }
   0xd   : > { %p223_p10 = pnand %p526_p6, %p222_p9 }
   0xe   : > { %p265_p11 = scmp.lt.s32.totalorder (!%p223_p10), %s669_s18, 1  ;;  %v679_v0 = vmov (!%p223_p10), 0   ;;  %v289_v1 = vld [vmem:[%s829_s2] sm:$0xff] (!%p223_p10)  ;;  %vm301_vm0 = vcmask (!%p223_p10), 1041408   ;;  %vm297_vm1 = vcmask (!%p223_p10), 31744   ;;  %s261_s14 = sand.u32 (!%p223_p10), 1, %s661_s16  }
   0xf   : > { %226 = sbr.rel (%p223_p10) target bundleno = 270 (0x10e), region = 36  ;;  %340 = vmatprep.mubr.bf16.mxu0 (!%p223_p10), %v679_v0  ;;  %597 = vset.pattern.permute.xlu0 (!%p223_p10), %v679_v0  ;;  %v290_v2 = vld [vmem:[%s830_s3] sm:$0xff] (!%p223_p10)  ;;  %s527_s21 = sshll.u32 (!%p223_p10), %s261_s14, 3 }
  0x10   : > { %351 = vperm.xlu0 (!%p223_p10), %597, %v289_v1   ;;  %v288_v8 = vld [vmem:[%s828_s1] sm:$0xf] (!%p223_p10)  ;;  %s540_s22 = sshll.u32 (!%p223_p10), %s669_s18, 7  ;;  %s263_s24 = scalar_lea.vmem (!%p223_p10), [#allocation2], %s527_s21 }
  0x11   : > { %s393_s26 = sshll.u32 (!%p223_p10), %s263_s24, 4  ;;  %s375_s6 = scalar_lea.sflag (!%p223_p10), [#allocation3], %s261_s14  ;;  %s782_s26 = int_to_ptr.vmem [resolvable:$true] %s393_s26 }
  0x12   : > { %s599_s7 = scalar_lea.vmem (!%p223_p10), %s782_s26, 128 }
  0x13   : > { %p600_p12 = scmp.ne.s32.totalorder (!%p223_p10), %s782_s26, %s599_s7 }
  0x14   : > { %358 = vperm.xlu0 (!%p223_p10), %597, %v290_v2  }
  0x15   : > { %p601_p13 = pnand (!%p223_p10), %p600_p12, %p746_p4 }
  0x16   : > { %s266_s5 = scalar_select %p265_p11, %s669_s18, 1 }
  0x17   : > { %p602_p0 = pneg %p601_p13  ;;  %s680_s18 = smov [#allocation2]  }
  0x18   : > { %s538_s8 = sshll.u32 %s266_s5, 3  ;;  %s780_s5 = scalar_lea.hbm %s831_s4, %s540_s22 }
  0x19   : > { %s272_s11 = scalar_lea.vmem %s827_s0, %s538_s8  ;;  %s603_s8 = sshll.u32 %s680_s18, 4  ;;  %s604_s8 = int_to_ptr.vmem [resolvable:$false] %s603_s8 }
  0x1a   : > { %v291_v3 = vld [vmem:[%s272_s11] sm:$0xff]  ;;  %s605_s9 = scalar_lea.vmem %s604_s8, 256  ;;  %p606_p1 = scmp.lt.s32.totalorder %s782_s26, %s604_s8 }
  0x1b   : > { %v293_v4 = vcombine.high %v291_v3, %v291_v3  ;;  %v295_v5 = vpack.c.bf16 %v291_v3, %v291_v3  ;;  %p607_p2 = scmp.lt.s32.totalorder %s605_s9, %s599_s7 }
  0x1d   : > { %v296_v6 = vpack.c.bf16 %v293_v4, %v293_v4  ;;  %v303_v7 = vsel %vm301_vm0, %v295_v5, 0  ;;  %p608_p3 = por %p607_p2, %p606_p1 }
  0x1f   : > { %530 = vmatprep.subr.msk.bf16.mxu0 %vm301_vm0, %v296_v6  ;;  %p609_p5 = pnand %p608_p3, %p602_p0 }
  0x20   : > { %309 = vmatpush1.bf16.msra.mxu0 %v303_v7 }
  0x23   : > { %531 = vmatmul.mubr.msk.bf16.vlgmr.msra.gmra.mrb[0].mxu0 %vm297_vm1, %v288_v8 }
  0x8f   : > { %v352_v9 = vpop.permute.xlu0 %351 }
  0x93   : > { %v359_v13 = vpop.permute.xlu0 %358 }
  0xf6   : > { %v342_v10 = vpop.f32.mrb[0].mxu0 }
  0xf7   : > { %v354_v11 = vmul.f32 %v352_v9, %v342_v10  ;;  %v344_v12 = vpop.f32.mrb[1].mxu0 }
  0xf8   : > { %v355_v14 = vmul.f32 %v352_v9, %v344_v12  ;;  %v346_v15 = vpop.f32.mrb[2].mxu0 }
  0xf9   : > { %v361_v16 = vadd.f32 %v359_v13, %v354_v11  ;;  %v347_v17 = vpop.f32.mrb[3].mxu0 }
  0xfa   : > { %v362_v18 = vadd.f32 %v359_v13, %v355_v14 }
  0xfb   : > { %v363_v19 = vmax.f32 %v361_v16, 0.0 }
  0xfc   : > { %v364_v20 = vmax.f32 %v362_v18, 0.0 }
  0xfe   : > { %v539_v21 = vpack.c.bf16 %v364_v20, %v363_v19 }
 0x100   : > { %373 = vst [vmem:[%s263_s24] sm:$0xff] %v539_v21 }
 0x101   : > { %612 = shalt.err (!%p609_p5)
}
 0x102   : > { %s613_s10 = scalar_lea.hbm %s780_s5, 128  ;;  %s617_s13 = scalar_lea.hbm %s831_s4, 256 }
 0x103   : > { %p614_p6 = scmp.ne.s32.totalorder %s780_s5, %s613_s10  ;;  %p618_p10 = scmp.lt.u32.totalorder %s780_s5, %s831_s4 }
 0x104   : > { %p619_p11 = scmp.lt.u32.totalorder %s617_s13, %s613_s10  ;;  %p621_p13 = scmp.lt.u32.totalorder %s613_s10, %s780_s5 }
 0x105   : > { %p615_p7 = pnand %p614_p6, %p746_p4 }
 0x106   : > { %p620_p12 = por %p619_p11, %p618_p10 }
 0x107   : > { %p616_p9 = pneg %p615_p7 }
 0x108   : > { %p622_p0 = por %p621_p13, %p620_p12 }
 0x10a   : > { %p623_p1 = pnand %p622_p0, %p616_p9 }
 0x10c   : > { %626 = shalt.err (!%p623_p1)
}
 0x10d   : > { %541 = dma.vmem_to_hbm [thread:$0]  (%p746_p4), %s782_s26, 128, %s780_s5, %s375_s6  }
 0x10e PF: > { %p547_p2 = scmp.ge.s32.totalorder %s677_s20, 2  ;;  %s405_s22 = sand.u32 1, %s657_s15  }
 0x10f   : > { %s406_s24 = scalar_lea.sflag [#allocation3], %s405_s22 }
 0x110   : > { %p544_p3 = pnand %p547_p2, %p753_p8 }
 0x112   : > { %652 = dma.done.wait (!%p544_p3), %s406_s24, 128  }
 0x113   : > { %654 = vsyncadd (!%p544_p3), %s406_s24, 4294967168  ;;  %s17_s20 = sadd.s32 1, %s677_s20   ;;  %s834_s15 = smov %s661_s16 }
 0x114   : > { %p14_p5 = scmp.ge.s32.totalorder %s17_s20, 4   ;;  %s835_s16 = smov %s665_s17 }
 0x115   : > { %s836_s17 = smov %s759_s28  ;;  %s837_s18 = smov %s673_s19 }
 0x116   : > { %s838_s19 = smov %s840_s23  ;;  %16 = sbr.rel (!%p14_p5) target bundleno = 4 (0x4), region = 80 }
 0x11d   :  { %411 = vsyncpa [#allocation3], 1 }
 0x11e   :  { %413 = vsyncpa [#allocation3 + $0x1], 1 }

</bundles_post_ra>
